<compile_context>
chip_gen: v7x
topology: tpu7x:2x2x1
jax: 0.10.0
libtpu: 0.0.40
codegen_flags: <defaults>
</compile_context>

<pallas_src>
import functools
import math

import jax
import jax.numpy as jnp
from jax.experimental import pallas as pl
from jax.experimental.pallas import tpu as pltpu

_LANES = 128
_SUBLANES = 8
_ACC_ROWS = 512            # fixed-height f32 partial-sum accumulator (256 KiB)


# ---------------------------------------------------------------------------
# Hardware-aware configuration
# ---------------------------------------------------------------------------
def _cdiv(a, b):
    return -(-a // b)


def _round_up(a, m):
    return _cdiv(a, m) * m


_HW_CONFIG = None


def _hw_config():
    """(parallel cores, scoped-VMEM limit bytes, per-input block byte target)."""
    global _HW_CONFIG
    if _HW_CONFIG is None:
        vmem_bytes = None
        try:
            vmem_bytes = getattr(pltpu.get_tpu_info(), "vmem_capacity_bytes", None)
        except Exception:
            vmem_bytes = None
        if vmem_bytes is None:
            # Unknown hardware: conservative settings that compile everywhere.
            _HW_CONFIG = (1, 32 * 1024 * 1024, 2 * 1024 * 1024)
        elif vmem_bytes <= 64 * 1024 * 1024:
            # v7x-class: 64 MiB VMEM per TC, 2 TensorCores per chip -> shard the
            # stream across cores, keep scoped VMEM well under the physical cap.
            _HW_CONFIG = (2, 48 * 1024 * 1024, 2 * 1024 * 1024)
        else:
            # v5e / v6e: single TensorCore, 128 MiB VMEM -> bigger blocks.
            _HW_CONFIG = (1, 64 * 1024 * 1024, 4 * 1024 * 1024)
    return _HW_CONFIG


def _geometry(n_elems, itemsize):
    """Tiling for a flat stream of `n_elems` elements of `itemsize` bytes."""
    ncores, vmem_limit, block_bytes = _hw_config()
    rows = _cdiv(n_elems, _LANES)                     # true (unpadded) row count
    per_core = _cdiv(rows, ncores)
    # Dtype-aware byte target per block (bf16 -> twice the rows of f32).
    target_rows = max(_ACC_ROWS, block_bytes // (_LANES * itemsize))
    if per_core <= target_rows:
        tile_rows = _round_up(per_core, _SUBLANES)
        acc_rows = tile_rows
    else:
        tile_rows = _round_up(target_rows, _ACC_ROWS)
        acc_rows = _ACC_ROWS
    k = _cdiv(rows, ncores * tile_rows)               # reduction steps per core
    nb = _cdiv(rows, tile_rows)                       # number of real block rows
    return ncores, vmem_limit, rows, tile_rows, acc_rows, k, nb


def _as_slab(x, pad_value):
    """Free reshape to (rows, 128); tiny neutral pad only if n % 128 != 0."""
    flat = x.reshape(-1)
    rem = flat.shape[0] % _LANES
    if rem:
        # Rare path: the only case that pays an HBM copy (lane-aligned tensors
        # are reshaped for free).  Pad value is neutral for the reduction.
        flat = jnp.pad(flat, (0, _LANES - rem), constant_values=pad_value)
    return flat.reshape(-1, _LANES)


def _row_block_map(k, nb, ncores):
    if ncores * k == nb:
        return lambda c, i: (c * k + i, 0)
    # Dummy trailing blocks (2-core split over-covering a short stream) are
    # clamped onto the last real block; their contribution is masked to zero
    # in-kernel, so they only cost a little redundant DMA.
    return lambda c, i: (jnp.minimum(c * k + i, nb - 1), 0)


# ---------------------------------------------------------------------------
# Pallas kernels
# ---------------------------------------------------------------------------
def _make_sq_diff_kernel(rows, tile_rows, acc_rows, k):
    chunks = tile_rows // acc_rows

    def kernel(a_ref, b_ref, o_ref, acc_ref):
        c = pl.program_id(0)
        i = pl.program_id(1)

        @pl.when(i == 0)
        def _():
            acc_ref[...] = jnp.zeros_like(acc_ref)

        row0 = (c * k + i) * tile_rows            # logical (unclamped) row offset
        row_iota = jax.lax.broadcasted_iota(jnp.int32, (acc_rows, _LANES), 0)
        for j in range(chunks):                   # static unroll: pure VPU filler
            sl = pl.ds(j * acc_rows, acc_rows)
            d = (a_ref[sl, :].astype(jnp.float32)
                 - b_ref[sl, :].astype(jnp.float32))
            valid = rows - row0 - j * acc_rows    # rows of this chunk in-bounds
            acc_ref[...] += jnp.where(row_iota < valid, d * d, 0.0)

        @pl.when(i == k - 1)
        def _():
            # Single epilogue cross-sublane (XLU) reduce -> lane-dense (1,128).
            o_ref[...] = jnp.sum(acc_ref[...], axis=0, keepdims=True)

    return kernel


def _make_sum_log_kernel(rows, tile_rows, acc_rows, k):
    chunks = tile_rows // acc_rows

    def kernel(x_ref, o_ref, acc_ref):
        c = pl.program_id(0)
        i = pl.program_id(1)

        @pl.when(i == 0)
        def _():
            acc_ref[...] = jnp.zeros_like(acc_ref)

        row0 = (c * k + i) * tile_rows
        row_iota = jax.lax.broadcasted_iota(jnp.int32, (acc_rows, _LANES), 0)
        for j in range(chunks):
            sl = pl.ds(j * acc_rows, acc_rows)
            valid = rows - row0 - j * acc_rows
            x = jnp.where(row_iota < valid,
                          x_ref[sl, :].astype(jnp.float32), 1.0)  # log(1) = 0
            acc_ref[...] += jnp.log(x)

        @pl.when(i == k - 1)
        def _():
            o_ref[...] = jnp.sum(acc_ref[...], axis=0, keepdims=True)

    return kernel


# ---------------------------------------------------------------------------
# Wrappers
# ---------------------------------------------------------------------------
def pallas_sum_sq_diff(a, b):
    """sum((a - b)^2) over all elements (f32 accumulation)."""
    n = a.size
    if n == 0:
        return jnp.float32(0.0)
    itemsize = max(jnp.dtype(a.dtype).itemsize, jnp.dtype(b.dtype).itemsize)
    ncores, vmem_limit, rows, tile_rows, acc_rows, k, nb = _geometry(n, itemsize)
    A = _as_slab(a, 0.0)                          # (0 - 0)^2 = 0 -> neutral pad
    B = _as_slab(b, 0.0)
    imap = _row_block_map(k, nb, ncores)
    parts = pl.pallas_call(
        _make_sq_diff_kernel(rows, tile_rows, acc_rows, k),
        out_shape=jax.ShapeDtypeStruct((1, ncores * _LANES), jnp.float32),
        grid_spec=pltpu.PrefetchScalarGridSpec(
            num_scalar_prefetch=0,
            grid=(ncores, k),
            in_specs=[pl.BlockSpec((tile_rows, _LANES), imap),
                      pl.BlockSpec((tile_rows, _LANES), imap)],
            out_specs=pl.BlockSpec((1, _LANES), lambda c, i: (0, c)),
            scratch_shapes=[pltpu.VMEM((acc_rows, _LANES), jnp.float32)],
        ),
        compiler_params=pltpu.CompilerParams(
            dimension_semantics=("parallel", "arbitrary"),
            vmem_limit_bytes=vmem_limit,
        ),
    )(A, B)
    return jnp.sum(parts)


def pallas_sum_log(x):
    """sum(log(x)) over all elements of x (f32 accumulation; log(0) -> -inf)."""
    n = x.size
    if n == 0:
        return jnp.float32(0.0)
    ncores, vmem_limit, rows, tile_rows, acc_rows, k, nb = _geometry(
        n, jnp.dtype(x.dtype).itemsize)
    X = _as_slab(x, 1.0)                          # log(1) = 0 -> neutral pad
    imap = _row_block_map(k, nb, ncores)
    parts = pl.pallas_call(
        _make_sum_log_kernel(rows, tile_rows, acc_rows, k),
        out_shape=jax.ShapeDtypeStruct((1, ncores * _LANES), jnp.float32),
        grid_spec=pltpu.PrefetchScalarGridSpec(
            num_scalar_prefetch=0,
            grid=(ncores, k),
            in_specs=[pl.BlockSpec((tile_rows, _LANES), imap)],
            out_specs=pl.BlockSpec((1, _LANES), lambda c, i: (0, c)),
            scratch_shapes=[pltpu.VMEM((acc_rows, _LANES), jnp.float32)],
        ),
        compiler_params=pltpu.CompilerParams(
            dimension_semantics=("parallel", "arbitrary"),
            vmem_limit_bytes=vmem_limit,
        ),
    )(X)
    return jnp.sum(parts)


@functools.partial(jax.jit, static_argnames=("lmbda", "loss_type"))
def rate_distortion_loss(output, target, lmbda=0.01, loss_type="mse"):
    """JAX/Pallas equivalent of RateDistortionLoss.forward (type='mse').

    output: dict with 'x_hat' (N,C,H,W) and 'likelihoods' (dict of arrays).
    target: (N,C,H,W).
    """
    N, _, H, W = target.shape
    num_pixels = N * H * W
    out = {}

    # bpp_loss = sum_k sum(log(likelihoods_k)) / (-ln(2) * num_pixels)
    # One pallas_call per likelihood tensor (no concatenated/cast HBM copy).
    total_log = jnp.float32(0.0)
    for lik in output["likelihoods"].values():
        total_log = total_log + pallas_sum_log(lik)
    out["bpp_loss"] = total_log / (-math.log(2) * num_pixels)

    if loss_type == "mse":
        out["mse_loss"] = pallas_sum_sq_diff(output["x_hat"], target) / target.size
        out["loss"] = lmbda * (255 ** 2) * out["mse_loss"] + out["bpp_loss"]
    else:
        # TODO(synk): MS-SSIM branch (gaussian-pyramid multi-scale SSIM) has no
        # clean single-kernel Pallas equivalent here; only 'mse' is implemented.
        raise NotImplementedError("only type='mse' is implemented")
    return out


# ---------------------------------------------------------------------------
# Demo / self-check
# ---------------------------------------------------------------------------
if __name__ == "__main__":
    key = jax.random.PRNGKey(0)
    k1, k2, k3, k4 = jax.random.split(key, 4)

    N, C, H, W = 2, 3, 16, 16
    target = jax.random.uniform(k1, (N, C, H, W), dtype=jnp.float32)
    x_hat = jnp.clip(target + 0.05 * jax.random.normal(k2, (N, C, H, W)), 0.0, 1.0)

    # Synthetic entropy-model likelihoods (values in (0, 1]), e.g. 'y' and 'z'.
    # lik_y is lane-aligned (256 elems); lik_z (32 elems) exercises the pad path.
    lik_y = jax.random.uniform(k3, (N, 8, H // 4, W // 4), minval=0.05, maxval=1.0)
    lik_z = jax.random.uniform(k4, (N, 4, H // 8, W // 8), minval=0.05, maxval=1.0)

    output = {"x_hat": x_hat, "likelihoods": {"y": lik_y, "z": lik_z}}

    res = rate_distortion_loss(output, target, lmbda=0.01, loss_type="mse")
    res = jax.tree_util.tree_map(jax.block_until_ready, res)

    # Pure-JAX reference check.
    num_pixels = N * H * W
    ref_bpp = sum(jnp.sum(jnp.log(l)) / (-math.log(2) * num_pixels)
                  for l in output["likelihoods"].values())
    ref_mse = jnp.mean((x_hat - target) ** 2)
    ref_loss = 0.01 * (255 ** 2) * ref_mse + ref_bpp

    assert jnp.allclose(res["bpp_loss"], ref_bpp, rtol=1e-5, atol=1e-5)
    assert jnp.allclose(res["mse_loss"], ref_mse, rtol=1e-5, atol=1e-6)
    assert jnp.allclose(res["loss"], ref_loss, rtol=1e-5, atol=1e-5)

    print("KERNEL_OK")
</pallas_src>

<mosaic_0001>
module attributes {stable_mosaic.version = 11 : i64} {
  func.func @kernel(%arg0: i32, %arg1: i32, %arg2: memref<8x128xf32, #tpu.memory_space<vmem>>, %arg3: memref<1x128xf32, #tpu.memory_space<vmem>>, %arg4: memref<8x128xf32, #tpu.memory_space<vmem>>) attributes {dimension_semantics = [#tpu.dimension_semantics<parallel>, #tpu.dimension_semantics<arbitrary>], iteration_bounds = array<i64: 1, 1>, scalar_prefetch = 0 : i64, scratch_operands = 1 : i64, tpu.core_type = #tpu.core_type<tc>, window_params = [{transform_indices = @transform_0, window_bounds = array<i64: 8, 128>}, {transform_indices = @transform_1, window_bounds = array<i64: 1, 128>}]} {
    %c0_i32 = arith.constant 0 : i32
    %0 = arith.cmpi eq, %arg1, %c0_i32 : i32
    %1 = arith.extui %0 : i1 to i32
    %c0_i32_0 = arith.constant 0 : i32
    %2 = arith.cmpi ne, %1, %c0_i32_0 : i32
    scf.if %2 {
      %cst_9 = arith.constant 0.000000e+00 : f32
      %21 = vector.broadcast %cst_9 : f32 to vector<8x128xf32>
      %c0_10 = arith.constant 0 : index
      %c0_11 = arith.constant 0 : index
      %22 = vector.load %arg4[%c0_10, %c0_11] : memref<8x128xf32, #tpu.memory_space<vmem>>, vector<8x128xf32>
      tpu.vector_store %arg4[%c0_10, %c0_11], %21 {strides = array<i32>} : memref<8x128xf32, #tpu.memory_space<vmem>>, vector<8x128xf32>,
    } else {
    }
    %c1_i32 = arith.constant 1 : i32
    %3 = arith.muli %arg0, %c1_i32 : i32
    %4 = arith.addi %3, %arg1 : i32
    %c8_i32 = arith.constant 8 : i32
    %5 = arith.muli %4, %c8_i32 : i32
    %6 = tpu.iota {dimensions = array<i32: 0>} : vector<8x128xi32>
    %c2_i32 = arith.constant 2 : i32
    %7 = arith.subi %c2_i32, %5 : i32
    %c0_i32_1 = arith.constant 0 : i32
    %8 = arith.subi %7, %c0_i32_1 : i32
    %9 = vector.broadcast %8 : i32 to vector<8x128xi32>
    %10 = arith.cmpi slt, %6, %9 : vector<8x128xi32>
    %c0 = arith.constant 0 : index
    %c0_2 = arith.constant 0 : index
    %11 = vector.load %arg2[%c0, %c0_2] : memref<8x128xf32, #tpu.memory_space<vmem>>, vector<8x128xf32>
    %cst = arith.constant 1.000000e+00 : f32
    %12 = vector.broadcast %cst : f32 to vector<8x128xf32>
    %13 = arith.select %10, %11, %12 : vector<8x128xi1>, vector<8x128xf32>
    %c0_3 = arith.constant 0 : index
    %c0_4 = arith.constant 0 : index
    %14 = vector.load %arg4[%c0_3, %c0_4] : memref<8x128xf32, #tpu.memory_space<vmem>>, vector<8x128xf32>
    %15 = math.log %13 : vector<8x128xf32>
    %16 = arith.addf %14, %15 : vector<8x128xf32>
    %c0_5 = arith.constant 0 : index
    %c0_6 = arith.constant 0 : index
    %17 = vector.load %arg4[%c0_5, %c0_6] : memref<8x128xf32, #tpu.memory_space<vmem>>, vector<8x128xf32>
    tpu.vector_store %arg4[%c0_5, %c0_6], %16 {strides = array<i32>} : memref<8x128xf32, #tpu.memory_space<vmem>>, vector<8x128xf32>,
    %c0_i32_7 = arith.constant 0 : i32
    %18 = arith.cmpi eq, %arg1, %c0_i32_7 : i32
    %19 = arith.extui %18 : i1 to i32
    %c0_i32_8 = arith.constant 0 : i32
    %20 = arith.cmpi ne, %19, %c0_i32_8 : i32
    scf.if %20 {
      %c0_9 = arith.constant 0 : index
      %c0_10 = arith.constant 0 : index
      %21 = vector.load %arg4[%c0_9, %c0_10] : memref<8x128xf32, #tpu.memory_space<vmem>>, vector<8x128xf32>
      %cst_11 = arith.constant dense<0.000000e+00> : vector<128xf32>
      %22 = vector.multi_reduction <add>, %21, %cst_11 [0] : vector<8x128xf32> to vector<128xf32>
      %23 = vector.shape_cast %22 : vector<128xf32> to vector<1x128xf32>
      %c0_12 = arith.constant 0 : index
      %c0_13 = arith.constant 0 : index
      %24 = vector.load %arg3[%c0_12, %c0_13] : memref<1x128xf32, #tpu.memory_space<vmem>>, vector<1x128xf32>
      tpu.vector_store %arg3[%c0_12, %c0_13], %23 {strides = array<i32>} : memref<1x128xf32, #tpu.memory_space<vmem>>, vector<1x128xf32>,
    } else {
    }
    return
  }
  func.func @transform_0(%arg0: i32, %arg1: i32) -> (i32, i32) {
    %c1_i32 = arith.constant 1 : i32
    %0 = arith.muli %arg0, %c1_i32 : i32
    %1 = arith.addi %0, %arg1 : i32
    %c0_i32 = arith.constant 0 : i32
    %c0_i32_0 = arith.constant 0 : i32
    return %1, %c0_i32 : i32, i32
  }
  func.func @transform_1(%arg0: i32, %arg1: i32) -> (i32, i32) {
    %c0_i32 = arith.constant 0 : i32
    %c0_i32_0 = arith.constant 0 : i32
    return %c0_i32, %arg0 : i32, i32
  }
}

module attributes {stable_mosaic.version = 11 : i64} {
  func.func @kernel(%arg0: i32, %arg1: i32, %arg2: memref<8x128xf32, #tpu.memory_space<vmem>>, %arg3: memref<1x128xf32, #tpu.memory_space<vmem>>, %arg4: memref<8x128xf32, #tpu.memory_space<vmem>>) attributes {dimension_semantics = [#tpu.dimension_semantics<parallel>, #tpu.dimension_semantics<arbitrary>], iteration_bounds = array<i64: 1, 1>, scalar_prefetch = 0 : i64, scratch_operands = 1 : i64, tpu.core_type = #tpu.core_type<tc>, window_params = [{transform_indices = @transform_0, window_bounds = array<i64: 8, 128>}, {transform_indices = @transform_1, window_bounds = array<i64: 1, 128>}]} {
    %c0_i32 = arith.constant 0 : i32
    %0 = arith.cmpi eq, %arg1, %c0_i32 : i32
    %1 = arith.extui %0 : i1 to i32
    %c0_i32_0 = arith.constant 0 : i32
    %2 = arith.cmpi ne, %1, %c0_i32_0 : i32
    scf.if %2 {
      %cst_10 = arith.constant 0.000000e+00 : f32
      %21 = vector.broadcast %cst_10 : f32 to vector<8x128xf32>
      %c0_11 = arith.constant 0 : index
      %c0_12 = arith.constant 0 : index
      %22 = vector.load %arg4[%c0_11, %c0_12] : memref<8x128xf32, #tpu.memory_space<vmem>>, vector<8x128xf32>
      tpu.vector_store %arg4[%c0_11, %c0_12], %21 {strides = array<i32>} : memref<8x128xf32, #tpu.memory_space<vmem>>, vector<8x128xf32>,
    } else {
    }
    %c1_i32 = arith.constant 1 : i32
    %3 = arith.muli %arg0, %c1_i32 : i32
    %4 = arith.addi %3, %arg1 : i32
    %c8_i32 = arith.constant 8 : i32
    %5 = arith.muli %4, %c8_i32 : i32
    %6 = tpu.iota {dimensions = array<i32: 0>} : vector<8x128xi32>
    %c1_i32_1 = arith.constant 1 : i32
    %7 = arith.subi %c1_i32_1, %5 : i32
    %c0_i32_2 = arith.constant 0 : i32
    %8 = arith.subi %7, %c0_i32_2 : i32
    %9 = vector.broadcast %8 : i32 to vector<8x128xi32>
    %10 = arith.cmpi slt, %6, %9 : vector<8x128xi32>
    %c0 = arith.constant 0 : index
    %c0_3 = arith.constant 0 : index
    %11 = vector.load %arg2[%c0, %c0_3] : memref<8x128xf32, #tpu.memory_space<vmem>>, vector<8x128xf32>
    %cst = arith.constant 1.000000e+00 : f32
    %12 = vector.broadcast %cst : f32 to vector<8x128xf32>
    %13 = arith.select %10, %11, %12 : vector<8x128xi1>, vector<8x128xf32>
    %c0_4 = arith.constant 0 : index
    %c0_5 = arith.constant 0 : index
    %14 = vector.load %arg4[%c0_4, %c0_5] : memref<8x128xf32, #tpu.memory_space<vmem>>, vector<8x128xf32>
    %15 = math.log %13 : vector<8x128xf32>
    %16 = arith.addf %14, %15 : vector<8x128xf32>
    %c0_6 = arith.constant 0 : index
    %c0_7 = arith.constant 0 : index
    %17 = vector.load %arg4[%c0_6, %c0_7] : memref<8x128xf32, #tpu.memory_space<vmem>>, vector<8x128xf32>
    tpu.vector_store %arg4[%c0_6, %c0_7], %16 {strides = array<i32>} : memref<8x128xf32, #tpu.memory_space<vmem>>, vector<8x128xf32>,
    %c0_i32_8 = arith.constant 0 : i32
    %18 = arith.cmpi eq, %arg1, %c0_i32_8 : i32
    %19 = arith.extui %18 : i1 to i32
    %c0_i32_9 = arith.constant 0 : i32
    %20 = arith.cmpi ne, %19, %c0_i32_9 : i32
    scf.if %20 {
      %c0_10 = arith.constant 0 : index
      %c0_11 = arith.constant 0 : index
      %21 = vector.load %arg4[%c0_10, %c0_11] : memref<8x128xf32, #tpu.memory_space<vmem>>, vector<8x128xf32>
      %cst_12 = arith.constant dense<0.000000e+00> : vector<128xf32>
      %22 = vector.multi_reduction <add>, %21, %cst_12 [0] : vector<8x128xf32> to vector<128xf32>
      %23 = vector.shape_cast %22 : vector<128xf32> to vector<1x128xf32>
      %c0_13 = arith.constant 0 : index
      %c0_14 = arith.constant 0 : index
      %24 = vector.load %arg3[%c0_13, %c0_14] : memref<1x128xf32, #tpu.memory_space<vmem>>, vector<1x128xf32>
      tpu.vector_store %arg3[%c0_13, %c0_14], %23 {strides = array<i32>} : memref<1x128xf32, #tpu.memory_space<vmem>>, vector<1x128xf32>,
    } else {
    }
    return
  }
  func.func @transform_0(%arg0: i32, %arg1: i32) -> (i32, i32) {
    %c1_i32 = arith.constant 1 : i32
    %0 = arith.muli %arg0, %c1_i32 : i32
    %1 = arith.addi %0, %arg1 : i32
    %c0_i32 = arith.constant 0 : i32
    %c0_i32_0 = arith.constant 0 : i32
    return %1, %c0_i32 : i32, i32
  }
  func.func @transform_1(%arg0: i32, %arg1: i32) -> (i32, i32) {
    %c0_i32 = arith.constant 0 : i32
    %c0_i32_0 = arith.constant 0 : i32
    return %c0_i32, %arg0 : i32, i32
  }
}

module attributes {stable_mosaic.version = 11 : i64} {
  func.func @kernel(%arg0: i32, %arg1: i32, %arg2: memref<16x128xf32, #tpu.memory_space<vmem>>, %arg3: memref<16x128xf32, #tpu.memory_space<vmem>>, %arg4: memref<1x128xf32, #tpu.memory_space<vmem>>, %arg5: memref<16x128xf32, #tpu.memory_space<vmem>>) attributes {dimension_semantics = [#tpu.dimension_semantics<parallel>, #tpu.dimension_semantics<arbitrary>], iteration_bounds = array<i64: 1, 1>, scalar_prefetch = 0 : i64, scratch_operands = 1 : i64, tpu.core_type = #tpu.core_type<tc>, window_params = [{transform_indices = @transform_0, window_bounds = array<i64: 16, 128>}, {transform_indices = @transform_1, window_bounds = array<i64: 16, 128>}, {transform_indices = @transform_2, window_bounds = array<i64: 1, 128>}]} {
    %c0_i32 = arith.constant 0 : i32
    %0 = arith.cmpi eq, %arg1, %c0_i32 : i32
    %1 = arith.extui %0 : i1 to i32
    %c0_i32_0 = arith.constant 0 : i32
    %2 = arith.cmpi ne, %1, %c0_i32_0 : i32
    scf.if %2 {
      %cst_11 = arith.constant 0.000000e+00 : f32
      %23 = vector.broadcast %cst_11 : f32 to vector<16x128xf32>
      %c0_12 = arith.constant 0 : index
      %c0_13 = arith.constant 0 : index
      %24 = vector.load %arg5[%c0_12, %c0_13] : memref<16x128xf32, #tpu.memory_space<vmem>>, vector<16x128xf32>
      tpu.vector_store %arg5[%c0_12, %c0_13], %23 {strides = array<i32>} : memref<16x128xf32, #tpu.memory_space<vmem>>, vector<16x128xf32>,
    } else {
    }
    %c1_i32 = arith.constant 1 : i32
    %3 = arith.muli %arg0, %c1_i32 : i32
    %4 = arith.addi %3, %arg1 : i32
    %c16_i32 = arith.constant 16 : i32
    %5 = arith.muli %4, %c16_i32 : i32
    %6 = tpu.iota {dimensions = array<i32: 0>} : vector<16x128xi32>
    %c0 = arith.constant 0 : index
    %c0_1 = arith.constant 0 : index
    %7 = vector.load %arg2[%c0, %c0_1] : memref<16x128xf32, #tpu.memory_space<vmem>>, vector<16x128xf32>
    %c0_2 = arith.constant 0 : index
    %c0_3 = arith.constant 0 : index
    %8 = vector.load %arg3[%c0_2, %c0_3] : memref<16x128xf32, #tpu.memory_space<vmem>>, vector<16x128xf32>
    %9 = arith.subf %7, %8 : vector<16x128xf32>
    %c12_i32 = arith.constant 12 : i32
    %10 = arith.subi %c12_i32, %5 : i32
    %c0_i32_4 = arith.constant 0 : i32
    %11 = arith.subi %10, %c0_i32_4 : i32
    %c0_5 = arith.constant 0 : index
    %c0_6 = arith.constant 0 : index
    %12 = vector.load %arg5[%c0_5, %c0_6] : memref<16x128xf32, #tpu.memory_space<vmem>>, vector<16x128xf32>
    %13 = vector.broadcast %11 : i32 to vector<16x128xi32>
    %14 = arith.cmpi slt, %6, %13 : vector<16x128xi32>
    %15 = arith.mulf %9, %9 : vector<16x128xf32>
    %cst = arith.constant 0.000000e+00 : f32
    %16 = vector.broadcast %cst : f32 to vector<16x128xf32>
    %17 = arith.select %14, %15, %16 : vector<16x128xi1>, vector<16x128xf32>
    %18 = arith.addf %12, %17 : vector<16x128xf32>
    %c0_7 = arith.constant 0 : index
    %c0_8 = arith.constant 0 : index
    %19 = vector.load %arg5[%c0_7, %c0_8] : memref<16x128xf32, #tpu.memory_space<vmem>>, vector<16x128xf32>
    tpu.vector_store %arg5[%c0_7, %c0_8], %18 {strides = array<i32>} : memref<16x128xf32, #tpu.memory_space<vmem>>, vector<16x128xf32>,
    %c0_i32_9 = arith.constant 0 : i32
    %20 = arith.cmpi eq, %arg1, %c0_i32_9 : i32
    %21 = arith.extui %20 : i1 to i32
    %c0_i32_10 = arith.constant 0 : i32
    %22 = arith.cmpi ne, %21, %c0_i32_10 : i32
    scf.if %22 {
      %c0_11 = arith.constant 0 : index
      %c0_12 = arith.constant 0 : index
      %23 = vector.load %arg5[%c0_11, %c0_12] : memref<16x128xf32, #tpu.memory_space<vmem>>, vector<16x128xf32>
      %cst_13 = arith.constant dense<0.000000e+00> : vector<128xf32>
      %24 = vector.multi_reduction <add>, %23, %cst_13 [0] : vector<16x128xf32> to vector<128xf32>
      %25 = vector.shape_cast %24 : vector<128xf32> to vector<1x128xf32>
      %c0_14 = arith.constant 0 : index
      %c0_15 = arith.constant 0 : index
      %26 = vector.load %arg4[%c0_14, %c0_15] : memref<1x128xf32, #tpu.memory_space<vmem>>, vector<1x128xf32>
      tpu.vector_store %arg4[%c0_14, %c0_15], %25 {strides = array<i32>} : memref<1x128xf32, #tpu.memory_space<vmem>>, vector<1x128xf32>,
    } else {
    }
    return
  }
  func.func @transform_0(%arg0: i32, %arg1: i32) -> (i32, i32) {
    %c1_i32 = arith.constant 1 : i32
    %0 = arith.muli %arg0, %c1_i32 : i32
    %1 = arith.addi %0, %arg1 : i32
    %c0_i32 = arith.constant 0 : i32
    %c0_i32_0 = arith.constant 0 : i32
    return %1, %c0_i32 : i32, i32
  }
  func.func @transform_1(%arg0: i32, %arg1: i32) -> (i32, i32) {
    %c1_i32 = arith.constant 1 : i32
    %0 = arith.muli %arg0, %c1_i32 : i32
    %1 = arith.addi %0, %arg1 : i32
    %c0_i32 = arith.constant 0 : i32
    %c0_i32_0 = arith.constant 0 : i32
    return %1, %c0_i32 : i32, i32
  }
  func.func @transform_2(%arg0: i32, %arg1: i32) -> (i32, i32) {
    %c0_i32 = arith.constant 0 : i32
    %c0_i32_0 = arith.constant 0 : i32
    return %c0_i32, %arg0 : i32, i32
  }
}

</mosaic_0001>

<bundles_post_ra>
// kernel: rate_distortion_loss.3
= control target key start
LH: loop header
LB: loop body
LE: loop exit
PB: predicated region body
PF: predicated region fallthrough
CT: control target
= control target key end

     0   :  { %v47_v0 = vlaneseq  ;;  %s98_s0 = inlined_call_operand.vmem [shape: f32[2,128], index: 0, kind: input, shape index: {}]   ;;  %s99_s1 = inlined_call_operand.vmem [shape: f32[1,128], index: 1, kind: output, shape index: {}]  }
   0x1   :  { %v52_v2 = vld [vmem:[%s98_s0] sm:$0xff] }
   0x2   :  { %v48_v1 = vshrl.u32 %v47_v0, 7 }
   0x4   :  { %vm51_vm0 = vcmp.lt.s32.totalorder %v48_v1, 2 }
   0x5   :  { %v53_v3 = vsel %vm51_vm0, %v52_v2, 1.0 }
   0x6   :  { %80 = vlog2.f32 %v53_v3 }
  0x10   :  { %v81_v4 = vpop.eup %80 }
  0x11   :  { %v56_v5 = vmul.f32 0.6931472, %v81_v4 }
  0x13   :  { %v63_v6 = vrot.slane %v56_v5, 4 }
  0x15   :  { %v64_v7 = vadd.f32 %v63_v6, %v56_v5 }
  0x17   :  { %v65_v8 = vrot.slane %v64_v7, 2 }
  0x19   :  { %v66_v9 = vadd.f32 %v65_v8, %v64_v7 }
  0x1b   :  { %v67_v10 = vrot.slane %v66_v9, 1 }
  0x1d   :  { %v68_v11 = vadd.f32 %v67_v10, %v66_v9 }
  0x1f   :  { %69 = vst [vmem:[%s99_s1] sm:$0x1] %v68_v11 }

// kernel: rate_distortion_loss.4
= control target key start
LH: loop header
LB: loop body
LE: loop exit
PB: predicated region body
PF: predicated region fallthrough
CT: control target
= control target key end

     0   :  { %v44_v0 = vlaneseq  ;;  %s92_s0 = inlined_call_operand.vmem [shape: f32[1,128], index: 0, kind: input, shape index: {}]   ;;  %s93_s1 = inlined_call_operand.vmem [shape: f32[1,128], index: 1, kind: output, shape index: {}]  }
   0x1   :  { %v49_v2 = vld [vmem:[%s92_s0] sm:$0xff] }
   0x2   :  { %v45_v1 = vshrl.u32 %v44_v0, 7 }
   0x4   :  { %vm48_vm0 = vcmp.lt.s32.totalorder %v45_v1, 1 }
   0x5   :  { %v50_v3 = vsel %vm48_vm0, %v49_v2, 1.0 }
   0x6   :  { %74 = vlog2.f32 %v50_v3 }
  0x10   :  { %v75_v4 = vpop.eup %74 }
  0x11   :  { %v53_v5 = vmul.f32 0.6931472, %v75_v4 }
  0x13   :  { %v60_v6 = vrot.slane %v53_v5, 4 }
  0x15   :  { %v61_v7 = vadd.f32 %v60_v6, %v53_v5 }
  0x17   :  { %v62_v8 = vrot.slane %v61_v7, 2 }
  0x19   :  { %v63_v9 = vadd.f32 %v62_v8, %v61_v7 }
  0x1b   :  { %v64_v10 = vrot.slane %v63_v9, 1 }
  0x1d   :  { %v65_v11 = vadd.f32 %v64_v10, %v63_v9 }
  0x1f   :  { %66 = vst [vmem:[%s93_s1] sm:$0x1] %v65_v11 }

// kernel: rate_distortion_loss.5
= control target key start
LH: loop header
LB: loop body
LE: loop exit
PB: predicated region body
PF: predicated region fallthrough
CT: control target
= control target key end

     0   :  { %v63_v0 = vlaneseq  ;;  %s145_s0 = inlined_call_operand.vmem [shape: f32[12,128], index: 0, kind: input, shape index: {}]   ;;  %s146_s1 = inlined_call_operand.vmem [shape: f32[12,128], index: 1, kind: input, shape index: {}]   ;;  %s147_s2 = inlined_call_operand.vmem [shape: f32[1,128], index: 2, kind: output, shape index: {}]  }
   0x1   :  { %v66_v1 = vld [vmem:[%s145_s0] sm:$0xff]  ;;  %v67_v2 = vld [vmem:[%s145_s0 + $0x8] sm:$0xff] }
   0x2   :  { %v68_v3 = vld [vmem:[%s146_s1] sm:$0xff]  ;;  %v64_v4 = vshrl.u32 %v63_v0, 7  ;;  %v69_v5 = vld [vmem:[%s146_s1 + $0x8] sm:$0xff] }
   0x3   :  { %v70_v6 = vsub.f32 %v66_v1, %v68_v3  ;;  %v71_v7 = vsub.f32 %v67_v2, %v69_v5 }
   0x4   :  { %v65_v8 = vadd.s32 8, %v64_v4 }
   0x5   :  { %v78_v9 = vmul.f32 %v70_v6, %v70_v6  ;;  %v79_v10 = vmul.f32 %v71_v7, %v71_v7 }
   0x6   :  { %vm77_vm0 = vcmp.lt.s32.totalorder %v65_v8, 12 }
   0x7   :  { %v81_v11 = vsel %vm77_vm0, %v79_v10, 0.0 }
   0x8   :  { %v91_v12 = vadd.f32 %v81_v11, %v78_v9 }
   0xa   :  { %v92_v13 = vrot.slane %v91_v12, 4 }
   0xc   :  { %v93_v14 = vadd.f32 %v92_v13, %v91_v12 }
   0xe   :  { %v94_v15 = vrot.slane %v93_v14, 2 }
  0x10   :  { %v95_v16 = vadd.f32 %v94_v15, %v93_v14 }
  0x12   :  { %v96_v17 = vrot.slane %v95_v16, 1 }
  0x14   :  { %v97_v18 = vadd.f32 %v96_v17, %v95_v16 }
  0x16   :  { %98 = vst [vmem:[%s147_s2] sm:$0x1] %v97_v18 }

</bundles_post_ra>
